<compile_context>
chip_gen: v6e
topology: v6e:2x2x1
jax: 0.10.0
libtpu: 0.0.40
codegen_flags: <defaults>
</compile_context>

<pallas_src>
import math

import jax
import jax.numpy as jnp
from jax.experimental import pallas as pl
from jax.experimental.pallas import tpu as pltpu


_BLOCK_TARGET_BYTES = 4 * 1024 * 1024      # ~4 MiB blocks (safe on all generations)
_VMEM_LIMIT_BYTES = 48 * 1024 * 1024       # < v7x's 64 MiB physical, roomy on v5e/v6e
_MAX_LANE_WIDTH = 4096                     # folded lane width cap (multiple of 128)


def make_positional_encoding(d_model, max_len=5000, dtype=jnp.float32):
    """Build the `pe` buffer exactly as the PyTorch __init__ does.

    Returned shape is (max_len, d_model), stored in the model dtype so the forward
    path never casts the full buffer.  The torch buffer's middle dim of 1 is just
    the batch-broadcast axis and is handled by the kernel / wrapper.
    """
    position = jnp.arange(0, max_len, dtype=jnp.float32)[:, None]            # (max_len, 1)
    div_term = jnp.exp(
        jnp.arange(0, d_model, 2, dtype=jnp.float32) * (-math.log(10000.0) / d_model)
    )
    angles = position * div_term                                             # (max_len, d/2)
    pe = jnp.zeros((max_len, d_model), dtype=jnp.float32)
    pe = pe.at[:, 0::2].set(jnp.sin(angles))
    pe = pe.at[:, 1::2].set(jnp.cos(angles))
    return pe.astype(dtype)


def _add_kernel(x_ref, pe_ref, o_ref):
    # Pure elementwise add.  In the 3-D path pe has block shape (ts, 1, D) and
    # broadcasts over the batch (sublane) axis; in the folded lane-dense path the
    # blocks are shape-identical.  No cross-lane tile/concat is ever generated.
    o_ref[...] = x_ref[...] + pe_ref[...]


def _sublane_pack(dtype):
    # 8 rows/vreg for 32-bit, 16 for bf16, 32 for int8/fp8.
    return max(8, 32 // jnp.dtype(dtype).itemsize)


def _largest_divisor_leq(n, cap):
    cap = max(1, min(cap, n))
    for d in range(cap, 0, -1):
        if n % d == 0:
            return d
    return 1


def _pick_row_tile(n_rows, row_bytes, sublane):
    """Leading-dim tile: ~_BLOCK_TARGET_BYTES per block, sublane-aligned (or full extent)."""
    t = max(1, _BLOCK_TARGET_BYTES // max(1, row_bytes))
    if t < n_rows:
        t = max(sublane, (t // sublane) * sublane)
    t = min(t, n_rows)
    # Ensure >= 2 grid steps once the stream is big enough to pipeline / split
    # across v7x's two TensorCores.
    if t == n_rows and n_rows * row_bytes > (8 << 20) and n_rows >= 2 * sublane:
        t = max(sublane, ((n_rows // 2) // sublane) * sublane)
    return t


@jax.jit
def positional_encoding_forward(x, pe):
    """x: (S, B, D); pe: (max_len, D) or (max_len, 1, D).  Returns x + pe[:S] (eval dropout)."""
    S, B, D = x.shape
    if pe.ndim == 3:                      # accept the torch-style (max_len, 1, D) buffer
        pe = pe.reshape(pe.shape[0], pe.shape[-1])
    max_len, d_model = pe.shape
    assert d_model == D, f"pe d_model {d_model} != x d_model {D}"
    assert S <= max_len, f"seq_len {S} exceeds max_len {max_len}"

    itemsize = jnp.dtype(x.dtype).itemsize
    sub = _sublane_pack(x.dtype)
    params = pltpu.CompilerParams(
        dimension_semantics=("parallel",),
        vmem_limit_bytes=_VMEM_LIMIT_BYTES,
    )

    if D % 128 == 0:
        # ---- 3-D sublane-broadcast path: D is already lane-dense. -------------------
        # pe is indexed straight out of the full (max_len, 1, D) buffer (no per-call
        # slice, O(S*D) traffic) and broadcast over the batch axis inside the kernel.
        if pe.dtype != x.dtype:
            # Normally a no-op: init stores pe in the model dtype (cast hoisted).
            pe = pe.astype(x.dtype)
        pe3 = pe.reshape(max_len, 1, D)
        # VMEM rounds the batch (sublane) dim up to the pack size; account for it.
        padded_row_bytes = ((B + sub - 1) // sub) * sub * D * itemsize
        ts = _pick_row_tile(S, padded_row_bytes, 1)
        grid = (pl.cdiv(S, ts),)
        return pl.pallas_call(
            _add_kernel,
            out_shape=jax.ShapeDtypeStruct((S, B, D), x.dtype),
            grid=grid,
            in_specs=[
                pl.BlockSpec((ts, B, D), lambda i: (i, 0, 0)),   # x tile
                pl.BlockSpec((ts, 1, D), lambda i: (i, 0, 0)),   # pe rows for this tile
            ],
            out_specs=pl.BlockSpec((ts, B, D), lambda i: (i, 0, 0)),
            compiler_params=params,
        )(x, pe3)

    # ---- Folded lane-dense path: B*D is not a multiple of 128 (e.g. 2*32 = 64). -----
    # A (S, B*D) layout would store through masked vst.msk on half-empty vregs, so fold
    # S into the lane axis instead: both x and the batch-replicated pe rows are viewed
    # as a flat (R, W) slab with W a multiple of 128.
    row = B * D
    N = S * row
    pe_rows = pe[:S]
    if pe_rows.dtype != x.dtype:
        pe_rows = pe_rows.astype(x.dtype)          # cast only the S rows actually used
    pe_slab = jnp.tile(pe_rows, (1, B)) if B > 1 else pe_rows   # (S, B*D), tiny fused XLA op

    if N % 128 == 0:
        W = 128 * _largest_divisor_leq(N // 128, _MAX_LANE_WIDTH // 128)
    else:
        # TODO(synk): odd total sizes keep W = B*D (masked edge stores); pad N up to a
        # multiple of 128 if such shapes ever matter in production.
        W = row
    R = N // W
    x_flat = x.reshape(R, W)                       # free row-major view
    pe_flat = pe_slab.reshape(R, W)

    tr = _pick_row_tile(R, W * itemsize, sub)
    grid = (pl.cdiv(R, tr),)
    out_flat = pl.pallas_call(
        _add_kernel,
        out_shape=jax.ShapeDtypeStruct((R, W), x.dtype),
        grid=grid,
        in_specs=[
            pl.BlockSpec((tr, W), lambda i: (i, 0)),
            pl.BlockSpec((tr, W), lambda i: (i, 0)),
        ],
        out_specs=pl.BlockSpec((tr, W), lambda i: (i, 0)),
        compiler_params=params,
    )(x_flat, pe_flat)
    return out_flat.reshape(S, B, D)


if __name__ == "__main__":
    # Case 1: small shapes from the module's forward (seq, batch, d_model) = (8, 2, 32).
    # B*D = 64 < 128 -> exercises the folded lane-dense path.
    S, B, D = 8, 2, 32
    max_len = 5000
    key = jax.random.PRNGKey(0)
    x = jax.random.normal(key, (S, B, D), dtype=jnp.float32)
    pe = make_positional_encoding(D, max_len=max_len, dtype=jnp.float32)

    out = positional_encoding_forward(x, pe)
    out = jax.block_until_ready(out)

    ref = x + pe[:S][:, None, :]                   # eval-mode dropout == identity
    assert out.shape == (S, B, D)
    assert jnp.allclose(out, ref, atol=1e-6, rtol=1e-6), "mismatch vs reference (folded path)"

    # Case 2: d_model multiple of 128 -> exercises the 3-D sublane-broadcast path.
    S2, B2, D2 = 16, 2, 128
    x2 = jax.random.normal(jax.random.PRNGKey(0), (S2, B2, D2), dtype=jnp.float32)
    pe2 = make_positional_encoding(D2, max_len=256, dtype=jnp.float32)

    out2 = positional_encoding_forward(x2, pe2)
    out2 = jax.block_until_ready(out2)

    ref2 = x2 + pe2[:S2][:, None, :]
    assert out2.shape == (S2, B2, D2)
    assert jnp.allclose(out2, ref2, atol=1e-6, rtol=1e-6), "mismatch vs reference (3-D path)"

    print("KERNEL_OK")
</pallas_src>

<mosaic_0001>
module attributes {stable_mosaic.version = 11 : i64} {
  func.func @_add_kernel(%arg0: i32, %arg1: memref<1x512xf32, #tpu.memory_space<vmem>>, %arg2: memref<1x512xf32, #tpu.memory_space<vmem>>, %arg3: memref<1x512xf32, #tpu.memory_space<vmem>>) attributes {dimension_semantics = [#tpu.dimension_semantics<parallel>], iteration_bounds = array<i64: 1>, scalar_prefetch = 0 : i64, scratch_operands = 0 : i64, tpu.core_type = #tpu.core_type<tc>, window_params = [{transform_indices = @transform_0, window_bounds = array<i64: 1, 512>}, {transform_indices = @transform_1, window_bounds = array<i64: 1, 512>}, {transform_indices = @transform_2, window_bounds = array<i64: 1, 512>}]} {
    %c0 = arith.constant 0 : index
    %c0_0 = arith.constant 0 : index
    %0 = vector.load %arg1[%c0, %c0_0] : memref<1x512xf32, #tpu.memory_space<vmem>>, vector<1x512xf32>
    %c0_1 = arith.constant 0 : index
    %c0_2 = arith.constant 0 : index
    %1 = vector.load %arg2[%c0_1, %c0_2] : memref<1x512xf32, #tpu.memory_space<vmem>>, vector<1x512xf32>
    %2 = arith.addf %0, %1 : vector<1x512xf32>
    %c0_3 = arith.constant 0 : index
    %c0_4 = arith.constant 0 : index
    %3 = vector.load %arg3[%c0_3, %c0_4] : memref<1x512xf32, #tpu.memory_space<vmem>>, vector<1x512xf32>
    tpu.vector_store %arg3[%c0_3, %c0_4], %2 {strides = array<i32>} : memref<1x512xf32, #tpu.memory_space<vmem>>, vector<1x512xf32>,
    return
  }
  func.func @transform_0(%arg0: i32) -> (i32, i32) {
    %c0_i32 = arith.constant 0 : i32
    %c0_i32_0 = arith.constant 0 : i32
    return %arg0, %c0_i32 : i32, i32
  }
  func.func @transform_1(%arg0: i32) -> (i32, i32) {
    %c0_i32 = arith.constant 0 : i32
    %c0_i32_0 = arith.constant 0 : i32
    return %arg0, %c0_i32 : i32, i32
  }
  func.func @transform_2(%arg0: i32) -> (i32, i32) {
    %c0_i32 = arith.constant 0 : i32
    %c0_i32_0 = arith.constant 0 : i32
    return %arg0, %c0_i32 : i32, i32
  }
}

</mosaic_0001>

<bundles_post_ra>
// kernel: positional_encoding_forward.1
= control target key start
LH: loop header
LB: loop body
LE: loop exit
PB: predicated region body
PF: predicated region fallthrough
CT: control target
= control target key end

     0   :  { %v14_v0 = vlaneseq  ;;  %s47_s0 = inlined_call_operand.vmem [shape: f32[1,512], index: 0, kind: input, shape index: {}]   ;;  %s48_s1 = inlined_call_operand.vmem [shape: f32[1,512], index: 1, kind: input, shape index: {}]   ;;  %s49_s2 = inlined_call_operand.vmem [shape: f32[1,512], index: 2, kind: output, shape index: {}]  }
   0x1   :  { %v11_v1 = vld [vmem:[%s47_s0] sm:$0xf] }
   0x2   :  { %v12_v2 = vld [vmem:[%s48_s1] sm:$0xf]  ;;  %vm16_vm0 = vcmp.lt.s32.totalorder %v14_v0, 512 }
   0x3   :  { %v13_v3 = vadd.f32 %v12_v2, %v11_v1 }
   0x5   :  { %18 = vst.msk [vmem:[%s49_s2] sm:$0xf] %vm16_vm0, %v13_v3 }

</bundles_post_ra>
